<compile_context>
chip_gen: v7x
topology: tpu7x:2x2x1
jax: 0.10.0
libtpu: 0.0.40
codegen_flags: <defaults>
</compile_context>

<pallas_src>
import functools

import jax
import jax.numpy as jnp
from jax.experimental import pallas as pl
from jax.experimental.pallas import tpu as pltpu

_LANE = 128
# ~8 MiB per block: at 3.2 TB/s (v7x) a block's read+write is ~5 us, so the
# ~0.35 us per-grid-step overhead is <10%.  Double-buffered in+out = 4x block
# = 32 MiB, which we allow via an explicit scoped-VMEM limit below.
_TARGET_BLOCK_BYTES = 8 * 1024 * 1024
# Tensors above this get split into an even number (>= 2) of blocks so both
# v7x TensorCores are used; below it a single full-extent block is cheapest.
_MIN_SPLIT_BYTES = 2 * 1024 * 1024
# Conservative block size for the rare ragged 1-D path (1-D VMEM buffers may
# be laid out sublane-sparse, so leave ample headroom under the VMEM limit).
_RAGGED_BLOCK_BYTES = 512 * 1024
# Explicit scoped-VMEM limit: > 4 x 8 MiB blocks, < v7x's 64 MiB physical.
_VMEM_LIMIT_BYTES = 40 * 1024 * 1024


def _min_sublane(dtype) -> int:
    """Native sublane granularity (rows per hardware tile) for a dtype."""
    itemsize = jnp.dtype(dtype).itemsize
    return {4: 8, 2: 16, 1: 32}.get(itemsize, 8)


def _tolerance_kernel(x_ref, o_ref, *, low, high):
    # loss = low - x          where x < low
    #        max(x - high, 0) otherwise
    # Single-select form; exactly matches the PyTorch two-where form (for
    # x >= low, max() clips precisely on the low <= x <= high zero branch,
    # including degenerate low > high where the max never clips).
    x = x_ref[...]
    o_ref[...] = jnp.where(x < low, low - x, jnp.maximum(x - high, 0.0))


def _pick_block_rows(rows, row_bytes, sub):
    """Pick block_rows: ~_TARGET_BLOCK_BYTES blocks, even grid length >= 2.

    Returns either the full extent (small tensors) or a multiple of `sub`;
    a partial last block (rows not divisible) is handled by Pallas clipping.
    """
    total_bytes = rows * row_bytes
    if total_bytes <= _MIN_SPLIT_BYTES or rows < 2 * sub:
        return rows  # single full-extent block (always a legal block shape)
    max_block_rows = max((_TARGET_BLOCK_BYTES // row_bytes) // sub * sub, sub)
    # Smallest even number of blocks whose blocks fit the target size; keeps
    # both v7x TensorCores busy (the "parallel" grid axis shards across them).
    num_blocks = max(2, pl.cdiv(rows, max_block_rows))
    if num_blocks % 2:
        num_blocks += 1
    block_rows = pl.cdiv(pl.cdiv(rows, num_blocks), sub) * sub
    return max(block_rows, sub)


def _pallas_elementwise(x, block_shape, grid, low, high):
    """Run the tolerance kernel over x with the given block shape / 1-D grid."""
    ndim = len(block_shape)
    if ndim == 2:
        index_map = lambda i: (i, 0)
    else:
        index_map = lambda i: (i,)
    kernel = functools.partial(_tolerance_kernel, low=low, high=high)
    return pl.pallas_call(
        kernel,
        out_shape=jax.ShapeDtypeStruct(x.shape, x.dtype),
        grid_spec=pltpu.PrefetchScalarGridSpec(
            num_scalar_prefetch=0,
            grid=grid,
            in_specs=[pl.BlockSpec(block_shape, index_map)],
            out_specs=pl.BlockSpec(block_shape, index_map),
        ),
        compiler_params=pltpu.CompilerParams(
            dimension_semantics=("parallel",),
            vmem_limit_bytes=_VMEM_LIMIT_BYTES,
        ),
    )(x)


def _run_2d(x2d, low, high):
    """Elementwise kernel over a lane-dense (rows, width) slab. 1 read+1 write."""
    rows, width = x2d.shape
    itemsize = jnp.dtype(x2d.dtype).itemsize
    sub = _min_sublane(x2d.dtype)
    block_rows = _pick_block_rows(rows, width * itemsize, sub)
    grid = (pl.cdiv(rows, block_rows),)
    return _pallas_elementwise(x2d, (block_rows, width), grid, low, high)


def _run_1d(x1d, low, high, block_elems=None):
    """Ragged fallback: grid the flat array directly; last block is clipped."""
    (n,) = x1d.shape
    itemsize = jnp.dtype(x1d.dtype).itemsize
    tile = _min_sublane(x1d.dtype) * _LANE
    if block_elems is None:
        if n * itemsize <= _RAGGED_BLOCK_BYTES:
            block_elems = n  # single full-extent block (legal for any n)
        else:
            # TODO(synk): conservative ~512 KiB blocks on this rare path; a
            # wider sweep could raise this once 1-D VMEM layout is confirmed
            # dense for tile-aligned lengths.
            block_elems = max((_RAGGED_BLOCK_BYTES // itemsize) // tile * tile,
                              tile)
    grid = (pl.cdiv(n, block_elems),)
    return _pallas_elementwise(x1d, (block_elems,), grid, low, high)


def tolerance_loss(predictions, low=0.8, high=1.0, margin=0.1):
    """Elementwise tolerance loss; same shape/dtype as `predictions`."""
    eff_low = low + margin
    eff_high = high - margin

    orig_shape = predictions.shape
    dtype = predictions.dtype
    if not jnp.issubdtype(dtype, jnp.floating):
        # TODO(synk): integer inputs would need explicit promotion (PyTorch
        # promotes to float here); restrict to floating dtypes for now.
        raise TypeError(f"tolerance_loss requires a floating dtype, got {dtype}")

    n = predictions.size
    if n == 0:
        return jnp.zeros(orig_shape, dtype=dtype)

    flat = predictions.reshape(-1)  # metadata-only for contiguous inputs

    # Fast path: widest lane width (multiple of 128) that reshapes with zero
    # padding -> no extra HBM copies in the wrapper; full-width unmasked
    # stores; a partial last block (rows not sub-aligned) is clipped by Pallas.
    for width in (1024, 512, 256, 128):
        if n % width == 0:
            out2d = _run_2d(flat.reshape(n // width, width), eff_low, eff_high)
            return out2d.reshape(orig_shape)

    # Rare ragged path (numel not a multiple of 128): 1-D blocks with a
    # clipped partial last block — still exactly 1 HBM read + 1 HBM write.
    out1d = _run_1d(flat, eff_low, eff_high)
    return out1d.reshape(orig_shape)


def _reference(predictions, low=0.8, high=1.0, margin=0.1):
    eff_low = low + margin
    eff_high = high - margin
    loss = jnp.where(predictions < eff_low, eff_low - predictions,
                     predictions - eff_high)
    in_range = (predictions >= eff_low) & (predictions <= eff_high)
    return jnp.where(in_range, jnp.zeros_like(predictions), loss)


if __name__ == "__main__":
    keys = jax.random.split(jax.random.PRNGKey(0), 4)

    # Primary small NCHW predictions around the [0.8, 1.0] band
    # (fast 2D path, single full block).
    x = jax.random.uniform(keys[0], (2, 4, 16, 16), dtype=jnp.float32,
                           minval=0.5, maxval=1.3)
    out = jax.block_until_ready(tolerance_loss(x))
    assert out.shape == x.shape and out.dtype == x.dtype
    assert jnp.allclose(out, _reference(x), atol=1e-6, rtol=1e-6)

    # bf16 input (sublane granularity 16).
    xb = x.astype(jnp.bfloat16)
    outb = jax.block_until_ready(tolerance_loss(xb))
    assert outb.dtype == jnp.bfloat16
    assert jnp.allclose(outb.astype(jnp.float32),
                        _reference(xb).astype(jnp.float32), atol=1e-2)

    # Multi-block 2D path: even grid (2 blocks) with a clipped last block.
    x2 = jax.random.uniform(keys[1], (770, 1024), dtype=jnp.float32,
                            minval=0.5, maxval=1.3)
    out2 = jax.block_until_ready(tolerance_loss(x2))
    assert jnp.allclose(out2, _reference(x2), atol=1e-6, rtol=1e-6)

    # Ragged path (numel not a multiple of 128): single full 1-D block.
    x3 = jax.random.uniform(keys[2], (5, 7, 9), dtype=jnp.float32,
                            minval=0.5, maxval=1.3)
    out3 = jax.block_until_ready(tolerance_loss(x3))
    assert out3.shape == x3.shape
    assert jnp.allclose(out3, _reference(x3), atol=1e-6, rtol=1e-6)

    # Ragged multi-block 1-D path with a clipped last block (forced small block).
    x4 = jax.random.uniform(keys[3], (9001,), dtype=jnp.float32,
                            minval=0.5, maxval=1.3)
    out4 = jax.block_until_ready(_run_1d(x4, 0.9, 0.9, block_elems=1024))
    assert jnp.allclose(out4, _reference(x4), atol=1e-6, rtol=1e-6)

    print("KERNEL_OK")
</pallas_src>

<mosaic_0001>
module attributes {stable_mosaic.version = 11 : i64} {
  func.func @_tolerance_kernel(%arg0: i32, %arg1: memref<2x1024xf32, #tpu.memory_space<vmem>>, %arg2: memref<2x1024xf32, #tpu.memory_space<vmem>>) attributes {dimension_semantics = [#tpu.dimension_semantics<parallel>], iteration_bounds = array<i64: 1>, scalar_prefetch = 0 : i64, scratch_operands = 0 : i64, tpu.core_type = #tpu.core_type<tc>, window_params = [{transform_indices = @transform_0, window_bounds = array<i64: 2, 1024>}, {transform_indices = @transform_1, window_bounds = array<i64: 2, 1024>}]} {
    %c0 = arith.constant 0 : index
    %c0_0 = arith.constant 0 : index
    %0 = vector.load %arg1[%c0, %c0_0] : memref<2x1024xf32, #tpu.memory_space<vmem>>, vector<2x1024xf32>
    %cst = arith.constant 0.899999976 : f32
    %1 = vector.broadcast %cst : f32 to vector<2x1024xf32>
    %2 = arith.cmpf olt, %0, %1 : vector<2x1024xf32>
    %cst_1 = arith.constant 0.899999976 : f32
    %3 = vector.broadcast %cst_1 : f32 to vector<2x1024xf32>
    %4 = arith.subf %3, %0 : vector<2x1024xf32>
    %cst_2 = arith.constant 0.899999976 : f32
    %5 = vector.broadcast %cst_2 : f32 to vector<2x1024xf32>
    %6 = arith.subf %0, %5 : vector<2x1024xf32>
    %cst_3 = arith.constant 0.000000e+00 : f32
    %7 = vector.broadcast %cst_3 : f32 to vector<2x1024xf32>
    %8 = arith.maximumf %6, %7 : vector<2x1024xf32>
    %9 = arith.select %2, %4, %8 : vector<2x1024xi1>, vector<2x1024xf32>
    %c0_4 = arith.constant 0 : index
    %c0_5 = arith.constant 0 : index
    %10 = vector.load %arg2[%c0_4, %c0_5] : memref<2x1024xf32, #tpu.memory_space<vmem>>, vector<2x1024xf32>
    tpu.vector_store %arg2[%c0_4, %c0_5], %9 {strides = array<i32>} : memref<2x1024xf32, #tpu.memory_space<vmem>>, vector<2x1024xf32>,
    return
  }
  func.func @transform_0(%arg0: i32) -> (i32, i32) {
    %c0_i32 = arith.constant 0 : i32
    %c0_i32_0 = arith.constant 0 : i32
    return %arg0, %c0_i32 : i32, i32
  }
  func.func @transform_1(%arg0: i32) -> (i32, i32) {
    %c0_i32 = arith.constant 0 : i32
    %c0_i32_0 = arith.constant 0 : i32
    return %arg0, %c0_i32 : i32, i32
  }
}

</mosaic_0001>

<bundles_post_ra>
// kernel: tpu_custom_call.1
= control target key start
LH: loop header
LB: loop body
LE: loop exit
PB: predicated region body
PF: predicated region fallthrough
CT: control target
= control target key end

     0   :  { %6 = vsyncpa [#allocation3], 0  ;;  %s138_s0 = inlined_call_operand.hbm [shape: f32[2,1024], index: 0, kind: input, shape index: {}]   ;;  %s139_s1 = inlined_call_operand.hbm [shape: f32[2,1024], index: 1, kind: output, shape index: {}]  }
   0x1   :  { %7 = vsyncpa [#allocation4], 0  ;;  %s102_s6 = smov [#allocation2]   ;;  %s54_s10 = scalar_lea.hbm %s138_s0, 256 }
   0x2   :  { %s14_s7 = sshll.u32 %s102_s6, 4  ;;  %p55_p0 = scmp.ne.s32.totalorder %s138_s0, %s54_s10  ;;  %s15_s7 = int_to_ptr.vmem [resolvable:$true] %s14_s7 }
   0x3   :  { %p58_p1 = scmp.lt.u32.totalorder %s54_s10, %s138_s0 }
   0x5   :  { %p60_p2 = pnand %p58_p1, %p55_p0 }
   0x7   :  { %63 = shalt.err (!%p60_p2)
}
   0x8   :  { %s64_s15 = scalar_lea.vmem %s15_s7, 256  ;;  %p69_p4 = scmp.lt.s32.totalorder %s15_s7, %s15_s7 }
   0x9   :  { %p65_p3 = scmp.ne.s32.totalorder %s15_s7, %s64_s15  ;;  %p70_p5 = scmp.lt.s32.totalorder %s64_s15, %s64_s15 }
   0xb   :  { %p71_p6 = por %p70_p5, %p69_p4 }
   0xd   :  { %p72_p7 = pnand %p71_p6, %p65_p3 }
   0xf   :  { %75 = shalt.err (!%p72_p7)
}
  0x10   :  { %17 = dma.hbm_to_vmem [thread:$0]  %s138_s0, 256, %s15_s7, [#allocation3]  }
  0x11   :  { %98 = dma.done.wait [#allocation3], 256  }
  0x12   :  { %99 = vsyncadd [#allocation3], 4294967040  ;;  %v21_v0 = vld [vmem:[#allocation2] sm:$0xff]  ;;  %v22_v1 = vld [vmem:[#allocation2 + $0x8] sm:$0xff]  ;;  %s103_s18 = smov [#allocation5]  }
  0x13   :  { %v25_v2 = vsub.f32 0.9, %v21_v0  ;;  %v50_v3 = vadd.f32 -0.9, %v21_v0  ;;  %s41_s19 = sshll.u32 %s103_s18, 4  ;;  %s42_s19 = int_to_ptr.vmem [resolvable:$true] %s41_s19 }
  0x14   :  { %vm23_vm0 = vcmp.lt.f32.partialorder %v21_v0, 0.9  ;;  %v26_v4 = vsub.f32 0.9, %v22_v1  ;;  %v51_v5 = vadd.f32 -0.9, %v22_v1  ;;  %p81_p9 = scmp.lt.s32.totalorder %s42_s19, %s42_s19 }
  0x15   :  { %v29_v6 = vmax.f32 %v50_v3, 0.0  ;;  %vm24_vm1 = vcmp.lt.f32.partialorder %v22_v1, 0.9  ;;  %s76_s0 = scalar_lea.vmem %s42_s19, 256 }
  0x16   :  { %v30_v7 = vmax.f32 %v51_v5, 0.0  ;;  %p77_p8 = scmp.ne.s32.totalorder %s42_s19, %s76_s0  ;;  %p82_p10 = scmp.lt.s32.totalorder %s76_s0, %s76_s0 }
  0x17   :  { %v31_v8 = vsel %vm23_vm0, %v25_v2, %v29_v6 }
  0x18   :  { %33 = vst [vmem:[#allocation5] sm:$0xff] %v31_v8  ;;  %v32_v9 = vsel %vm24_vm1, %v26_v4, %v30_v7  ;;  %p83_p11 = por %p82_p10, %p81_p9 }
  0x19   :  { %34 = vst [vmem:[#allocation5 + $0x8] sm:$0xff] %v32_v9 }
  0x1a   :  { %p84_p12 = pnand %p83_p11, %p77_p8 }
  0x1c   :  { %87 = shalt.err (!%p84_p12)
}
  0x1d   :  { %s88_s22 = scalar_lea.hbm %s139_s1, 256 }
  0x1e   :  { %p89_p13 = scmp.ne.s32.totalorder %s139_s1, %s88_s22  ;;  %p92_p0 = scmp.lt.u32.totalorder %s88_s22, %s139_s1 }
  0x20   :  { %p94_p1 = pnand %p92_p0, %p89_p13 }
  0x22   :  { %97 = shalt.err (!%p94_p1)
}
  0x23   :  { %44 = dma.vmem_to_hbm [thread:$0]  %s42_s19, 256, %s139_s1, [#allocation4]  }
  0x24   :  { %100 = dma.done.wait [#allocation4], 256  }
  0x25   :  { %101 = vsyncadd [#allocation4], 4294967040 }
  0x26   :  { %48 = vsyncpa [#allocation3], 1 }
  0x27   :  { %49 = vsyncpa [#allocation4], 1 }

</bundles_post_ra>
